<compile_context>
chip_gen: v7x
topology: tpu7x:2x2x1
jax: 0.10.0
libtpu: 0.0.40
codegen_flags: <defaults>
</compile_context>

<pallas_src>
import functools

import jax
import jax.numpy as jnp
from jax.experimental import pallas as pl
from jax.experimental.pallas import tpu as pltpu


def _round_up(v, m):
    return (v + m - 1) // m * m


def _corr2d_kernel(w_ref, b_ref, x_ref, halo_ref, o_ref, *,
                   kh, kw, strip_h, n_strips, c_strip, halo):
    # w_ref:    (kh, kw)          SMEM scalar taps
    # b_ref:    (1,)              SMEM bias
    # x_ref:    (tile_h, W)       VMEM main input rows of this output row-tile
    # halo_ref: (1, halo, W)      VMEM rows just below the main tile (>= kh-1 rows)
    # o_ref:    (tile_h, w_out)   VMEM output tile (partial last tile masked by Pallas)
    w_out = o_ref.shape[1]

    bias_v = b_ref[0]
    w_taps = [[w_ref[a, b] for b in range(kw)] for a in range(kh)]

    for s in range(n_strips):                         # static -> fully unrolled
        r0 = s * strip_h
        is_last_strip = (s == n_strips - 1)
        for c0 in range(0, w_out, c_strip):           # static column strips (<=512 lanes)
            cw = min(c_strip, w_out - c0)
            ce = cw + kw - 1                          # input columns needed by this strip

            # One load of the (strip_h + halo, ce) extended strip.  Only the bottom
            # strip of each tile needs the halo buffer (tiny concat, O(strip * ce)).
            if is_last_strip:
                xs = jnp.concatenate(
                    [x_ref[r0:r0 + strip_h, c0:c0 + ce],
                     halo_ref[0, :, c0:c0 + ce]],
                    axis=0)
            else:
                xs = x_ref[r0:r0 + strip_h + halo, c0:c0 + ce]

            # kh*kw taps on the register-resident strip; bias folded into tap (0,0).
            acc = w_taps[0][0] * xs[0:strip_h, 0:cw] + bias_v
            for a in range(kh):
                for b in range(kw):
                    if a == 0 and b == 0:
                        continue
                    acc = acc + w_taps[a][b] * xs[a:a + strip_h, b:b + cw]

            o_ref[r0:r0 + strip_h, c0:c0 + cw] = acc


def conv2d_forward(x, weight, bias, *, tile_h=None):
    """Pallas equivalent of Conv2D.forward: corr2d(x, weight) + bias.

    x:      (H, W) float32
    weight: (KH, KW) float32
    bias:   (1,) float32
    returns (H-KH+1, W-KW+1) float32
    """
    H, W = x.shape
    kh, kw = weight.shape
    h_out, w_out = H - kh + 1, W - kw + 1
    assert h_out > 0 and w_out > 0, "kernel larger than input"

    x = x.astype(jnp.float32)
    weight = weight.astype(jnp.float32)
    bias = bias.astype(jnp.float32)

    halo = _round_up(max(kh - 1, 1), 8)   # rows below each tile, sublane-aligned
    strip_h = max(16, halo)               # register-block height (multiple of 8)
    c_strip = 512                         # register-block width (output lanes)

    if tile_h is None:
        # ~2 MiB (f32) main-input tile: amortizes per-step pipeline overhead while
        # the double-buffered in+out working set stays well under the default
        # scoped-VMEM limit on v5e/v6e/v7x.
        target_rows = max(strip_h, (2 * 1024 * 1024) // (4 * max(W, 1)))
        target_rows = min(target_rows, 1024)          # cap in-kernel unroll
        tile_h = min(_round_up(h_out, strip_h), _round_up(target_rows, strip_h))
    else:
        tile_h = _round_up(max(tile_h, strip_h), strip_h)
    n_strips = tile_h // strip_h
    n_tiles = pl.cdiv(h_out, tile_h)

    # Tiny gathered halo (n_tiles, halo, W): the rows just below each row tile,
    # clamped to the last valid row.  Clamped rows only ever feed output rows
    # >= h_out, which Pallas masks out on writeback.  This avoids a full row-padded
    # HBM copy of x.
    starts = (jnp.arange(n_tiles, dtype=jnp.int32) + 1) * tile_h
    hrows = jnp.minimum(
        starts[:, None] + jnp.arange(halo, dtype=jnp.int32)[None, :], H - 1)
    halos = x[hrows]                                   # (n_tiles, halo, W)

    kernel = functools.partial(_corr2d_kernel, kh=kh, kw=kw, strip_h=strip_h,
                               n_strips=n_strips, c_strip=c_strip, halo=halo)

    return pl.pallas_call(
        kernel,
        out_shape=jax.ShapeDtypeStruct((h_out, w_out), jnp.float32),
        grid=(n_tiles,),
        in_specs=[
            pl.BlockSpec(memory_space=pltpu.MemorySpace.SMEM),    # weight taps
            pl.BlockSpec(memory_space=pltpu.MemorySpace.SMEM),    # bias
            pl.BlockSpec((tile_h, W), lambda i: (i, 0)),          # main input rows
            pl.BlockSpec((1, halo, W), lambda i: (i, 0, 0)),      # halo rows
        ],
        out_specs=pl.BlockSpec((tile_h, w_out), lambda i: (i, 0)),
        compiler_params=pltpu.CompilerParams(
            dimension_semantics=("parallel",),
        ),
        cost_estimate=pl.CostEstimate(
            flops=2 * kh * kw * h_out * w_out,
            transcendentals=0,
            bytes_accessed=4 * (H * W + n_tiles * halo * W + h_out * w_out),
        ),
    )(weight, bias, x, halos)


if __name__ == "__main__":
    key = jax.random.PRNGKey(0)
    kx, kw_key, kx2, kw2_key = jax.random.split(key, 4)

    def ref_corr2d(x, weight, bias):
        kh, kw = weight.shape
        h_out = x.shape[0] - kh + 1
        w_out = x.shape[1] - kw + 1
        ref = jnp.zeros((h_out, w_out), jnp.float32)
        for a in range(kh):
            for b in range(kw):
                ref = ref + weight[a, b] * x[a:a + h_out, b:b + w_out]
        return ref + bias[0]

    # Case 1: small square input, 3x3 kernel (single row tile).
    H, W, KH, KW = 16, 16, 3, 3
    x = jax.random.normal(kx, (H, W), dtype=jnp.float32)
    # Parameter init mirroring the module: weight ~ U[0,1), bias = zeros(1).
    weight = jax.random.uniform(kw_key, (KH, KW), dtype=jnp.float32)
    bias = jnp.zeros((1,), dtype=jnp.float32)
    out = jax.block_until_ready(conv2d_forward(x, weight, bias))
    assert out.shape == (H - KH + 1, W - KW + 1)
    assert jnp.allclose(out, ref_corr2d(x, weight, bias), atol=1e-5, rtol=1e-5)

    # Case 2: multiple row tiles (halo path) + non-128-multiple width.
    H2, W2 = 40, 200
    x2 = jax.random.normal(kx2, (H2, W2), dtype=jnp.float32)
    out2 = jax.block_until_ready(conv2d_forward(x2, weight, bias, tile_h=16))
    assert out2.shape == (H2 - KH + 1, W2 - KW + 1)
    assert jnp.allclose(out2, ref_corr2d(x2, weight, bias), atol=1e-4, rtol=1e-4)

    # Case 3: the module's original 6x8 input with a (1, 2) kernel.
    x3 = jax.random.normal(kx, (6, 8), dtype=jnp.float32)
    w3 = jax.random.uniform(kw2_key, (1, 2), dtype=jnp.float32)
    b3 = jnp.zeros((1,), dtype=jnp.float32)
    out3 = jax.block_until_ready(conv2d_forward(x3, w3, b3))
    assert out3.shape == (6, 7)
    assert jnp.allclose(out3, ref_corr2d(x3, w3, b3), atol=1e-5, rtol=1e-5)

    print("KERNEL_OK")
</pallas_src>

<mosaic_0001>
module attributes {stable_mosaic.version = 11 : i64} {
  func.func @_corr2d_kernel(%arg0: i32, %arg1: memref<3x3xf32, #tpu.memory_space<smem>>, %arg2: memref<1xf32, #tpu.memory_space<smem>>, %arg3: memref<16x16xf32, #tpu.memory_space<vmem>>, %arg4: memref<1x8x16xf32, #tpu.memory_space<vmem>>, %arg5: memref<16x14xf32, #tpu.memory_space<vmem>>) attributes {dimension_semantics = [#tpu.dimension_semantics<parallel>], iteration_bounds = array<i64: 1>, scalar_prefetch = 0 : i64, scratch_operands = 0 : i64, tpu.core_type = #tpu.core_type<tc>, window_params = [{transform_indices = @transform_0, window_bounds = array<i64: 3, 3>}, {transform_indices = @transform_1, window_bounds = array<i64: 1>}, {transform_indices = @transform_2, window_bounds = array<i64: 16, 16>}, {transform_indices = @transform_3, window_bounds = array<i64: 1, 8, 16>}, {transform_indices = @transform_4, window_bounds = array<i64: 16, 14>}]} {
    %c0 = arith.constant 0 : index
    %0 = memref.load %arg2[%c0] : memref<1xf32, #tpu.memory_space<smem>>
    %c0_0 = arith.constant 0 : index
    %c0_1 = arith.constant 0 : index
    %1 = memref.load %arg1[%c0_0, %c0_1] : memref<3x3xf32, #tpu.memory_space<smem>>
    %c0_2 = arith.constant 0 : index
    %c1 = arith.constant 1 : index
    %2 = memref.load %arg1[%c0_2, %c1] : memref<3x3xf32, #tpu.memory_space<smem>>
    %c0_3 = arith.constant 0 : index
    %c2 = arith.constant 2 : index
    %3 = memref.load %arg1[%c0_3, %c2] : memref<3x3xf32, #tpu.memory_space<smem>>
    %c1_4 = arith.constant 1 : index
    %c0_5 = arith.constant 0 : index
    %4 = memref.load %arg1[%c1_4, %c0_5] : memref<3x3xf32, #tpu.memory_space<smem>>
    %c1_6 = arith.constant 1 : index
    %c1_7 = arith.constant 1 : index
    %5 = memref.load %arg1[%c1_6, %c1_7] : memref<3x3xf32, #tpu.memory_space<smem>>
    %c1_8 = arith.constant 1 : index
    %c2_9 = arith.constant 2 : index
    %6 = memref.load %arg1[%c1_8, %c2_9] : memref<3x3xf32, #tpu.memory_space<smem>>
    %c2_10 = arith.constant 2 : index
    %c0_11 = arith.constant 0 : index
    %7 = memref.load %arg1[%c2_10, %c0_11] : memref<3x3xf32, #tpu.memory_space<smem>>
    %c2_12 = arith.constant 2 : index
    %c1_13 = arith.constant 1 : index
    %8 = memref.load %arg1[%c2_12, %c1_13] : memref<3x3xf32, #tpu.memory_space<smem>>
    %c2_14 = arith.constant 2 : index
    %c2_15 = arith.constant 2 : index
    %9 = memref.load %arg1[%c2_14, %c2_15] : memref<3x3xf32, #tpu.memory_space<smem>>
    %c0_16 = arith.constant 0 : index
    %c0_17 = arith.constant 0 : index
    %10 = vector.load %arg3[%c0_16, %c0_17] : memref<16x16xf32, #tpu.memory_space<vmem>>, vector<16x16xf32>
    %c0_18 = arith.constant 0 : index
    %c0_19 = arith.constant 0 : index
    %c0_20 = arith.constant 0 : index
    %11 = vector.load %arg4[%c0_18, %c0_19, %c0_20] : memref<1x8x16xf32, #tpu.memory_space<vmem>>, vector<1x8x16xf32>
    %12 = vector.shape_cast %11 : vector<1x8x16xf32> to vector<8x16xf32>
    %13 = tpu.concatenate %10, %12 in 0 : vector<16x16xf32>, vector<8x16xf32> -> vector<24x16xf32>
    %14 = vector.extract_strided_slice %13 {offsets = [0, 0], sizes = [16, 14], strides = [1, 1]} : vector<24x16xf32> to vector<16x14xf32>
    %15 = vector.broadcast %1 : f32 to vector<16x14xf32>
    %16 = arith.mulf %15, %14 : vector<16x14xf32>
    %17 = vector.broadcast %0 : f32 to vector<16x14xf32>
    %18 = arith.addf %16, %17 : vector<16x14xf32>
    %19 = vector.extract_strided_slice %13 {offsets = [0, 1], sizes = [16, 14], strides = [1, 1]} : vector<24x16xf32> to vector<16x14xf32>
    %20 = vector.broadcast %2 : f32 to vector<16x14xf32>
    %21 = arith.mulf %20, %19 : vector<16x14xf32>
    %22 = arith.addf %18, %21 : vector<16x14xf32>
    %23 = vector.extract_strided_slice %13 {offsets = [0, 2], sizes = [16, 14], strides = [1, 1]} : vector<24x16xf32> to vector<16x14xf32>
    %24 = vector.broadcast %3 : f32 to vector<16x14xf32>
    %25 = arith.mulf %24, %23 : vector<16x14xf32>
    %26 = arith.addf %22, %25 : vector<16x14xf32>
    %27 = vector.extract_strided_slice %13 {offsets = [1, 0], sizes = [16, 14], strides = [1, 1]} : vector<24x16xf32> to vector<16x14xf32>
    %28 = vector.broadcast %4 : f32 to vector<16x14xf32>
    %29 = arith.mulf %28, %27 : vector<16x14xf32>
    %30 = arith.addf %26, %29 : vector<16x14xf32>
    %31 = vector.extract_strided_slice %13 {offsets = [1, 1], sizes = [16, 14], strides = [1, 1]} : vector<24x16xf32> to vector<16x14xf32>
    %32 = vector.broadcast %5 : f32 to vector<16x14xf32>
    %33 = arith.mulf %32, %31 : vector<16x14xf32>
    %34 = arith.addf %30, %33 : vector<16x14xf32>
    %35 = vector.extract_strided_slice %13 {offsets = [1, 2], sizes = [16, 14], strides = [1, 1]} : vector<24x16xf32> to vector<16x14xf32>
    %36 = vector.broadcast %6 : f32 to vector<16x14xf32>
    %37 = arith.mulf %36, %35 : vector<16x14xf32>
    %38 = arith.addf %34, %37 : vector<16x14xf32>
    %39 = vector.extract_strided_slice %13 {offsets = [2, 0], sizes = [16, 14], strides = [1, 1]} : vector<24x16xf32> to vector<16x14xf32>
    %40 = vector.broadcast %7 : f32 to vector<16x14xf32>
    %41 = arith.mulf %40, %39 : vector<16x14xf32>
    %42 = arith.addf %38, %41 : vector<16x14xf32>
    %43 = vector.extract_strided_slice %13 {offsets = [2, 1], sizes = [16, 14], strides = [1, 1]} : vector<24x16xf32> to vector<16x14xf32>
    %44 = vector.broadcast %8 : f32 to vector<16x14xf32>
    %45 = arith.mulf %44, %43 : vector<16x14xf32>
    %46 = arith.addf %42, %45 : vector<16x14xf32>
    %47 = vector.extract_strided_slice %13 {offsets = [2, 2], sizes = [16, 14], strides = [1, 1]} : vector<24x16xf32> to vector<16x14xf32>
    %48 = vector.broadcast %9 : f32 to vector<16x14xf32>
    %49 = arith.mulf %48, %47 : vector<16x14xf32>
    %50 = arith.addf %46, %49 : vector<16x14xf32>
    %c0_21 = arith.constant 0 : index
    %c0_22 = arith.constant 0 : index
    %51 = vector.load %arg5[%c0_21, %c0_22] : memref<16x14xf32, #tpu.memory_space<vmem>>, vector<16x14xf32>
    tpu.vector_store %arg5[%c0_21, %c0_22], %50 {strides = array<i32>} : memref<16x14xf32, #tpu.memory_space<vmem>>, vector<16x14xf32>,
    return
  }
  func.func @transform_0(%arg0: i32) -> (i32, i32) {
    %c0_i32 = arith.constant 0 : i32
    %c0_i32_0 = arith.constant 0 : i32
    %c0_i32_1 = arith.constant 0 : i32
    return %c0_i32, %c0_i32_0 : i32, i32
  }
  func.func @transform_1(%arg0: i32) -> i32 {
    %c0_i32 = arith.constant 0 : i32
    %c0_i32_0 = arith.constant 0 : i32
    return %c0_i32 : i32
  }
  func.func @transform_2(%arg0: i32) -> (i32, i32) {
    %c0_i32 = arith.constant 0 : i32
    %c0_i32_0 = arith.constant 0 : i32
    return %arg0, %c0_i32 : i32, i32
  }
  func.func @transform_3(%arg0: i32) -> (i32, i32, i32) {
    %c0_i32 = arith.constant 0 : i32
    %c0_i32_0 = arith.constant 0 : i32
    %c0_i32_1 = arith.constant 0 : i32
    return %arg0, %c0_i32, %c0_i32_0 : i32, i32, i32
  }
  func.func @transform_4(%arg0: i32) -> (i32, i32) {
    %c0_i32 = arith.constant 0 : i32
    %c0_i32_0 = arith.constant 0 : i32
    return %arg0, %c0_i32 : i32, i32
  }
}

</mosaic_0001>

<bundles_post_ra>
// kernel: tpu_custom_call.1
= control target key start
LH: loop header
LB: loop body
LE: loop exit
PB: predicated region body
PF: predicated region fallthrough
CT: control target
= control target key end

     0   :  { %10 = vsyncpa [#allocation6], 0  ;;  %s428_s0 = inlined_call_operand.hbm [shape: f32[3,3], index: 0, kind: input, shape index: {}]   ;;  %s429_s1 = inlined_call_operand.<no memory space> [shape: f32[1], index: 1, kind: input, shape index: {}]   ;;  %s430_s2 = inlined_call_operand.hbm [shape: f32[16,16], index: 2, kind: input, shape index: {}]   ;;  %s431_s3 = inlined_call_operand.vmem [shape: f32[1,8,16], index: 3, kind: input, shape index: {}]   ;;  %s432_s4 = inlined_call_operand.hbm [shape: f32[14,14], index: 4, kind: output, shape index: {}]  }
   0x1   :  { %11 = vsyncpa [#allocation4], 0 }
   0x2   :  { %12 = vsyncpa [#allocation5], 0  ;;  %s239_s17 = scalar_lea.hbm %s428_s0, 64 }
   0x3   :  { %p240_p0 = scmp.ne.s32.totalorder %s428_s0, %s239_s17  ;;  %p243_p1 = scmp.lt.u32.totalorder %s239_s17, %s428_s0 }
   0x5   :  { %p245_p2 = pnand %p243_p1, %p240_p0 }
   0x7   :  { %248 = shalt.err (!%p245_p2)
}
   0x8   :  { %s299_s22 = smov [#allocation3]   ;;  %s300_s25 = smov [#allocation7]  }
   0x9   :  { %20 = dma.hbm_to_smem %s428_s0, 64, %s299_s22, [#allocation6]  }
   0xa   :  { %s28_s26 = sshll.u32 %s300_s25, 4  ;;  %s249_s29 = scalar_lea.hbm %s430_s2, 256  ;;  %s29_s26 = int_to_ptr.vmem [resolvable:$true] %s28_s26 }
   0xb   :  { %p250_p3 = scmp.ne.s32.totalorder %s430_s2, %s249_s29  ;;  %p253_p4 = scmp.lt.u32.totalorder %s249_s29, %s430_s2 }
   0xd   :  { %p255_p5 = pnand %p253_p4, %p250_p3 }
   0xf   :  { %258 = shalt.err (!%p255_p5)
}
  0x10   :  { %s259_s8 = scalar_lea.vmem %s29_s26, 256  ;;  %p264_p7 = scmp.lt.s32.totalorder %s29_s26, %s29_s26 }
  0x11   :  { %p260_p6 = scmp.ne.s32.totalorder %s29_s26, %s259_s8  ;;  %p265_p8 = scmp.lt.s32.totalorder %s259_s8, %s259_s8 }
  0x13   :  { %p266_p9 = por %p265_p8, %p264_p7 }
  0x15   :  { %p267_p10 = pnand %p266_p9, %p260_p6 }
  0x17   :  { %270 = shalt.err (!%p267_p10)
}
  0x18   :  { %s301_s0 = smov 128   ;;  %s302_s9 = smov 8  }
  0x19   :  { %34 = dma.hbm_to_vmem [thread:$0]  %s430_s2, 256, %s29_s26, [#allocation4], %s301_s0, %s301_s0, %s302_s9  }
  0x1a   :  { %293 = dma.done.wait [#allocation6], 64  }
  0x1b   :  { %294 = vsyncadd [#allocation6], 4294967232 }
  0x1c   :  { %295 = dma.done.wait [#allocation4], 256  }
  0x1d   :  { %296 = vsyncadd [#allocation4], 4294967040 }
  0x1e   :  { %43 = sfence }
  0x1f   :  { %s225_s12 = sld [smem:[#allocation3 + $0x2]]  ;;  %s224_s13 = sld [smem:[#allocation3 + $0x1]]  ;;  %v358_v0 = vld [vmem:[#allocation7] sm:$0xff]  ;;  %v360_v1 = vld [vmem:[#allocation7 + $0x8] sm:$0xff]  ;;  %vm96_vm0 = vcmask 1046528   ;;  %vm153_vm1 = vcmask 1045504  }
  0x20   :  { %s227_s14 = sld [smem:[#allocation3 + $0x81]]  ;;  %s228_s15 = sld [smem:[#allocation3 + $0x82]]  ;;  %v56_v3 = vld [vmem:[%s431_s3] sm:$0xff]  ;;  %vm203_vm2 = vcmask 113664  }
  0x21   :  { %s230_s16 = sld [smem:[#allocation3 + $0x101]]  ;;  %s365_s2 = sld [smem:[#allocation3 + $0x102]] }
  0x22   :  { %s226_s19 = sld [smem:[#allocation3 + $0x80]]  ;;  %s303_s21 = smov 126  }
  0x23   :  { %s229_s20 = sld [smem:[#allocation3 + $0x100]]  ;;  %s304_s3 = smov 127  }
  0x24   :  { %s45_s22 = sld [smem:[#allocation3]] }
  0x25   :  { %v76_v2 = vstv %s225_s12  ;;  %v63_v5 = vstv %s224_s13 }
  0x26   :  { %v77_v4 = vmul.f32 %v76_v2, %v358_v0  ;;  %v78_v6 = vmul.f32 %v76_v2, %v360_v1  ;;  %v64_v7 = vmul.f32 %v63_v5, %v358_v0  ;;  %v106_v8 = vstv %s227_s14 }
  0x27   :  { %v126_v9 = vstv %s228_s15  ;;  %v108_v10 = vmul.f32 %v106_v8, %v360_v1  ;;  %v109_v11 = vmul.f32 %v106_v8, %v56_v3  ;;  %v107_v12 = vmul.f32 %v106_v8, %v358_v0 }
  0x28   :  { %81 = vrot.lane.b32.xlu1 %v77_v4, %s303_s21  ;;  %v128_v13 = vmul.f32 %v126_v9, %v360_v1  ;;  %v65_v14 = vmul.f32 %v63_v5, %v360_v1  ;;  %68 = vrot.lane.b32.xlu0 %v64_v7, %s304_s3  ;;  %v129_v15 = vmul.f32 %v126_v9, %v56_v3  ;;  %v163_v16 = vstv %s230_s16 }
  0x29   :  { %v114_v17 = vrot.slane %v108_v10, 1  ;;  %v116_v18 = vrot.slane %v109_v11, 1  ;;  %v113_v19 = vrot.slane %v107_v12, 1  ;;  %v127_v20 = vmul.f32 %v126_v9, %v358_v0 }
  0x2a   :  { %v134_v21 = vrot.slane %v128_v13, 1  ;;  %v136_v22 = vrot.slane %v129_v15, 1  ;;  %v165_v23 = vmul.f32 %v163_v16, %v360_v1  ;;  %v166_v24 = vmul.f32 %v163_v16, %v56_v3 }
  0x2b   :  { %v117_v25 = vsel %vm96_vm0, %v114_v17, %v116_v18  ;;  %v183_v26 = vstv %s365_s2  ;;  %v115_v27 = vsel %vm96_vm0, %v113_v19, %v114_v17  ;;  %v133_v28 = vrot.slane %v127_v20, 1 }
  0x2c   :  { %83 = vrot.lane.b32.xlu1 %v78_v6, %s303_s21  ;;  %70 = vrot.lane.b32.xlu0 %v65_v14, %s304_s3  ;;  %v164_v29 = vmul.f32 %v163_v16, %v358_v0  ;;  %v89_v30 = vstv %s226_s19  ;;  %v146_v31 = vstv %s229_s20  ;;  %v137_v32 = vsel %vm96_vm0, %v134_v21, %v136_v22 }
  0x2d   :  { %v171_v33 = vrot.slane %v165_v23, 2  ;;  %v173_v34 = vrot.slane %v166_v24, 2  ;;  %v185_v35 = vmul.f32 %v183_v26, %v360_v1  ;;  %v186_v36 = vmul.f32 %v183_v26, %v56_v3 }
  0x2e   :  { %v91_v37 = vmul.f32 %v89_v30, %v360_v1  ;;  %v92_v38 = vmul.f32 %v89_v30, %v56_v3  ;;  %v90_v39 = vmul.f32 %v89_v30, %v358_v0  ;;  %v135_v40 = vsel %vm96_vm0, %v133_v28, %v134_v21 }
  0x2f   :  { %v170_v41 = vrot.slane %v164_v29, 2  ;;  %v184_v42 = vmul.f32 %v183_v26, %v358_v0  ;;  %v148_v43 = vmul.f32 %v146_v31, %v360_v1  ;;  %v191_v47 = vrot.slane %v185_v35, 2 }
  0x30   :  { %120 = vrot.lane.b32.xlu1 %v117_v25, %s304_s3  ;;  %118 = vrot.lane.b32.xlu0 %v115_v27, %s304_s3  ;;  %v98_v44 = vrot.slane %v91_v37, 1  ;;  %v100_v45 = vrot.slane %v92_v38, 1  ;;  %v97_v46 = vrot.slane %v90_v39, 1  ;;  %v149_v48 = vmul.f32 %v146_v31, %v56_v3 }
  0x31   :  { %v155_v49 = vrot.slane %v148_v43, 2  ;;  %v147_v50 = vmul.f32 %v146_v31, %v358_v0  ;;  %v174_v51 = vsel %vm153_vm1, %v171_v33, %v173_v34  ;;  %v193_v52 = vrot.slane %v186_v36, 2 }
  0x32   :  { %v101_v53 = vsel %vm96_vm0, %v98_v44, %v100_v45  ;;  %v99_v54 = vsel %vm96_vm0, %v97_v46, %v98_v44  ;;  %v172_v55 = vsel %vm153_vm1, %v170_v41, %v171_v33  ;;  %v190_v56 = vrot.slane %v184_v42, 2 }
  0x33   :  { %v157_v57 = vrot.slane %v149_v48, 2  ;;  %v154_v58 = vrot.slane %v147_v50, 2  ;;  %v194_v61 = vsel %vm153_vm1, %v191_v47, %v193_v52  ;;  %v57_v63 = vstv %s45_s22 }
  0x34   :  { %140 = vrot.lane.b32.xlu1 %v137_v32, %s303_s21  ;;  %138 = vrot.lane.b32.xlu0 %v135_v40, %s303_s21  ;;  %v192_v62 = vsel %vm153_vm1, %v190_v56, %v191_v47  ;;  %v58_v2 = vmul.f32 %v57_v63, %v358_v0  ;;  %v60_v3 = vstv %s429_s1  ;;  %v59_v5 = vmul.f32 %v57_v63, %v360_v1  ;;  %s305_s1 = smov [#allocation8]  }
  0x35   :  { %v158_v59 = vsel %vm153_vm1, %v155_v49, %v157_v57  ;;  %v156_v60 = vsel %vm153_vm1, %v154_v58, %v155_v49  ;;  %s211_s25 = sshll.u32 %s305_s1, 4  ;;  %s212_s25 = int_to_ptr.vmem [resolvable:$true] %s211_s25 }
  0x36   :  { %v61_v4 = vadd.f32 %v60_v3, %v58_v2  ;;  %v62_v9 = vadd.f32 %v60_v3, %v59_v5  ;;  %s271_s26 = scalar_lea.vmem %s212_s25, 256  ;;  %p276_p12 = scmp.lt.s32.totalorder %s212_s25, %s212_s25 }
  0x37   :  { %p272_p11 = scmp.ne.s32.totalorder %s212_s25, %s271_s26  ;;  %p277_p13 = scmp.lt.s32.totalorder %s271_s26, %s271_s26 }
  0x38   :  { %177 = vrot.lane.b32.xlu1 %v174_v51, %s304_s3  ;;  %175 = vrot.lane.b32.xlu0 %v172_v55, %s304_s3 }
  0x39   :  { %p278_p0 = por %p277_p13, %p276_p12 }
  0x3b   :  { %p279_p1 = pnand %p278_p0, %p272_p11 }
  0x3c   :  { %197 = vrot.lane.b32.xlu1 %v194_v61, %s303_s21  ;;  %195 = vrot.lane.b32.xlu0 %v192_v62, %s303_s21 }
  0x9a   :  { %v82_v6 = vpop.permute.xlu1 %81  ;;  %v69_v7 = vpop.permute.xlu0 %68 }
  0x9b   :  { %v74_v8 = vadd.f32 %v69_v7, %v61_v4 }
  0x9d   :  { %v87_v10 = vadd.f32 %v82_v6, %v74_v8 }
  0x9e   :  { %v84_v11 = vpop.permute.xlu1 %83  ;;  %v71_v12 = vpop.permute.xlu0 %70 }
  0x9f   :  { %v75_v13 = vadd.f32 %v71_v12, %v62_v9  ;;  %v104_v14 = vadd.f32 %v99_v54, %v87_v10 }
  0xa1   :  { %v88_v15 = vadd.f32 %v84_v11, %v75_v13 }
  0xa2   :  { %v121_v16 = vpop.permute.xlu1 %120  ;;  %v119_v17 = vpop.permute.xlu0 %118 }
  0xa3   :  { %v105_v0 = vadd.f32 %v101_v53, %v88_v15  ;;  %v124_v19 = vadd.f32 %v119_v17, %v104_v14 }
  0xa5   :  { %v125_v18 = vadd.f32 %v121_v16, %v105_v0 }
  0xa6   :  { %v141_v20 = vpop.permute.xlu1 %140  ;;  %v139_v21 = vpop.permute.xlu0 %138 }
  0xa7   :  { %v145_v22 = vadd.f32 %v141_v20, %v125_v18  ;;  %v144_v23 = vadd.f32 %v139_v21, %v124_v19 }
  0xa9   :  { %v162_v24 = vadd.f32 %v158_v59, %v145_v22  ;;  %v161_v25 = vadd.f32 %v156_v60, %v144_v23 }
  0xaa   :  { %v178_v1 = vpop.permute.xlu1 %177  ;;  %v176_v26 = vpop.permute.xlu0 %175 }
  0xab   :  { %v182_v27 = vadd.f32 %v178_v1, %v162_v24  ;;  %v181_v28 = vadd.f32 %v176_v26, %v161_v25 }
  0xae   :  { %v198_v29 = vpop.permute.xlu1 %197  ;;  %v196_v31 = vpop.permute.xlu0 %195 }
  0xaf   :  { %v202_v30 = vadd.f32 %v198_v29, %v182_v27  ;;  %v201_v32 = vadd.f32 %v196_v31, %v181_v28 }
  0xb1   :  { %205 = vst.msk [vmem:[#allocation8 + $0x8] sm:$0xff] %vm203_vm2, %v202_v30  ;;  %204 = vst.msk [vmem:[#allocation8] sm:$0xff] %vm203_vm2, %v201_v32 }
  0xb2   :  { %282 = shalt.err (!%p279_p1)
}
  0xb3   :  { %s283_s29 = scalar_lea.hbm %s432_s4, 256 }
  0xb4   :  { %p284_p2 = scmp.ne.s32.totalorder %s432_s4, %s283_s29  ;;  %p287_p3 = scmp.lt.u32.totalorder %s283_s29, %s432_s4 }
  0xb6   :  { %p289_p4 = pnand %p287_p3, %p284_p2 }
  0xb8   :  { %292 = shalt.err (!%p289_p4)
}
  0xb9   :  { %217 = dma.vmem_to_hbm [thread:$0]  %s212_s25, 256, %s432_s4, [#allocation5], %s301_s0, %s301_s0, %s302_s9  }
  0xba   :  { %297 = dma.done.wait [#allocation5], 256  }
  0xbb   :  { %298 = vsyncadd [#allocation5], 4294967040 }
  0xbc   :  { %221 = vsyncpa [#allocation4], 1 }
  0xbd   :  { %222 = vsyncpa [#allocation5], 1 }
  0xbe   :  { %223 = vsyncpa [#allocation6], 1 }

</bundles_post_ra>
